<compile_context>
chip_gen: v7x
topology: tpu7x:2x2x1
jax: 0.10.0
libtpu: 0.0.40
codegen_flags: <defaults>
</compile_context>

<pallas_src>
import functools

import jax
import jax.numpy as jnp
from jax.experimental import pallas as pl
from jax.experimental.pallas import tpu as pltpu


# --------------------------------------------------------------------------- #
# Kernel: streaming spatial sum / max pooling for one (batch block, HW split)
# --------------------------------------------------------------------------- #
def _pool_kernel(x_ref, sum_ref, max_ref, sum_acc, max_acc, *,
                 hw_tile, hw_valid, blocks_per_split, has_padding):
    # x_ref   : (b_tile, C, hw_tile)  native-dtype tile of the input stream
    # sum_ref : (b_tile, C) f32       partial spatial sum for this (b, s)
    # max_ref : (b_tile, C) f32       partial spatial max for this (b, s)
    # sum_acc : (b_tile, C) f32       running sum   (VMEM scratch)
    # max_acc : (b_tile, C) native    running max   (VMEM scratch)
    k = pl.program_id(2)

    # ---- init accumulators on the first spatial tile of this (b, s) -------
    @pl.when(k == 0)
    def _():
        sum_acc[...] = jnp.zeros_like(sum_acc)
        max_acc[...] = jnp.full_like(max_acc, -jnp.inf)

    x = x_ref[...]                                      # native dtype

    # Sum must accumulate in f32 (zero padding keeps it exact).
    sum_acc[...] += jnp.sum(x.astype(jnp.float32), axis=-1)

    # Max stays in the native dtype (exact: order-preserving in bf16).
    if not has_padding:
        max_acc[...] = jnp.maximum(max_acc[...], jnp.max(x, axis=-1))
    else:
        start = (pl.program_id(1) * blocks_per_split + k) * hw_tile
        has_tail = start + hw_tile > hw_valid

        @pl.when(jnp.logical_not(has_tail))
        def _():
            max_acc[...] = jnp.maximum(max_acc[...], jnp.max(x, axis=-1))

        @pl.when(has_tail)
        def _():
            # Only the single block containing the zero-padded tail pays this.
            lane = jax.lax.broadcasted_iota(jnp.int32, x.shape, dimension=2)
            xm = jnp.where(lane + start < hw_valid, x,
                           jnp.full_like(x, -jnp.inf))
            max_acc[...] = jnp.maximum(max_acc[...], jnp.max(xm, axis=-1))

    # ---- finalize: write the partials for this (b, s) ---------------------
    @pl.when(k == pl.num_programs(2) - 1)
    def _():
        sum_ref[...] = sum_acc[...]
        max_ref[...] = max_acc[...].astype(max_ref.dtype)


# --------------------------------------------------------------------------- #
# Tiling / VMEM heuristics
# --------------------------------------------------------------------------- #
def _pick_b_tile(B):
    # >=2 batch blocks when B is large; small B relies on the HW-split axis
    # for megacore parallelism instead.
    if B >= 16 and B % 8 == 0:
        return 8
    return B


def _pick_hw_tile(hw_pad, bytes_per_col, budget, want_even_blocks):
    # Largest lane-aligned (multiple of 128) divisor of hw_pad whose x tile
    # fits the per-buffer budget (double-buffered by the pipeline).  When the
    # batch axis has a single block, prefer an even block count so the HW
    # reduction can be split into two parallel halves (v7x dual-TC).
    cands = [t for t in range(128, hw_pad + 1, 128)
             if hw_pad % t == 0 and t * bytes_per_col <= budget]
    if not cands:
        return 128
    if want_even_blocks:
        even = [t for t in cands if (hw_pad // t) % 2 == 0]
        if even:
            return max(even)
    return max(cands)


def _vmem_budgets():
    # Chip-aware sizing: 128 MiB parts (v5e/v6e) can afford much larger tiles
    # than the 64 MiB-per-TC v7x.
    try:
        cap = pltpu.get_tpu_info().vmem_capacity_bytes
    except Exception:
        cap = 64 << 20                         # conservative fallback (v7x-like)
    if cap >= (100 << 20):                     # v5e / v6e: 128 MiB VMEM
        return 20 << 20, 96 << 20              # per-x-buffer budget, vmem_limit
    return 8 << 20, 44 << 20                   # v7x: 64 MiB VMEM per TC


# --------------------------------------------------------------------------- #
# Public wrapper
# --------------------------------------------------------------------------- #
def channel_attention(x, w1, w2):
    """CBAM ChannelAttention forward.

    x : (B, C, H, W) activations (f32 or bf16; streamed in native dtype)
    w1: (hidden, C)  weight of Conv2d(C, hidden, 1, bias=False)
    w2: (C, hidden)  weight of Conv2d(hidden, C, 1, bias=False)
    returns (B, C, 1, 1) = sigmoid(MLP(avgpool(x)) + MLP(maxpool(x))), x.dtype
    """
    B, C, H, W = x.shape
    HW = H * W

    # ---- Pallas part: the HBM-bound streaming pooling ----------------------
    x3 = x.reshape(B, C, HW)
    hw_pad = ((HW + 127) // 128) * 128         # lane-aligned padded extent
    if hw_pad != HW:
        x3 = jnp.pad(x3, ((0, 0), (0, 0), (0, hw_pad - HW)))  # zeros: exact sum

    per_buf_budget, vmem_limit = _vmem_budgets()
    b_tile = _pick_b_tile(B)
    b_blocks = B // b_tile
    hw_tile = _pick_hw_tile(hw_pad, b_tile * C * x3.dtype.itemsize,
                            per_buf_budget, want_even_blocks=(b_blocks < 2))
    num_blocks = hw_pad // hw_tile
    num_splits = 2 if (b_blocks < 2 and num_blocks % 2 == 0) else 1
    blocks_per_split = num_blocks // num_splits

    max_dtype = x3.dtype if x3.dtype == jnp.bfloat16 else jnp.float32

    kernel = functools.partial(
        _pool_kernel, hw_tile=hw_tile, hw_valid=HW,
        blocks_per_split=blocks_per_split, has_padding=(hw_pad != HW))

    part_sum, part_max = pl.pallas_call(
        kernel,
        out_shape=(jax.ShapeDtypeStruct((num_splits, B, C), jnp.float32),
                   jax.ShapeDtypeStruct((num_splits, B, C), jnp.float32)),
        grid_spec=pltpu.PrefetchScalarGridSpec(
            num_scalar_prefetch=0,
            grid=(b_blocks, num_splits, blocks_per_split),
            in_specs=[
                pl.BlockSpec(
                    (b_tile, C, hw_tile),
                    lambda b, s, k, bps=blocks_per_split: (b, 0, s * bps + k)),
            ],
            out_specs=(
                pl.BlockSpec((None, b_tile, C), lambda b, s, k: (s, b, 0)),
                pl.BlockSpec((None, b_tile, C), lambda b, s, k: (s, b, 0)),
            ),
            scratch_shapes=[
                pltpu.VMEM((b_tile, C), jnp.float32),   # running sum
                pltpu.VMEM((b_tile, C), max_dtype),     # running max
            ],
        ),
        compiler_params=pltpu.CompilerParams(
            dimension_semantics=("parallel", "parallel", "arbitrary"),
            vmem_limit_bytes=vmem_limit,
        ),
    )(x3)

    # ---- XLA part: tiny combine + shared MLP + sigmoid (negligible FLOPs) --
    avg = part_sum.sum(axis=0) * (1.0 / float(HW))       # (B, C)
    mx = part_max.max(axis=0)                            # (B, C)
    w1t = jnp.transpose(w1).astype(jnp.float32)          # (C, hidden)
    w2t = jnp.transpose(w2).astype(jnp.float32)          # (hidden, C)

    def mlp(v):
        return jnp.maximum(v @ w1t, 0.0) @ w2t

    att = jax.nn.sigmoid(mlp(avg) + mlp(mx))
    return att.astype(x.dtype).reshape(B, C, 1, 1)


# --------------------------------------------------------------------------- #
# Self-test
# --------------------------------------------------------------------------- #
if __name__ == "__main__":
    # Module config: in_planes=64, ratio=16 -> hidden=4
    B, C, H, W = 2, 64, 16, 16
    ratio = 16
    hidden = C // ratio

    key = jax.random.PRNGKey(0)
    kx, k1, k2 = jax.random.split(key, 3)
    x = jax.random.normal(kx, (B, C, H, W), dtype=jnp.float32)
    # Conv2d 1x1 weights with the spatial dims squeezed
    w1 = jax.random.normal(k1, (hidden, C), dtype=jnp.float32) * 0.1
    w2 = jax.random.normal(k2, (C, hidden), dtype=jnp.float32) * 0.1

    def reference(x_f32):
        avg = jnp.mean(x_f32, axis=(2, 3))                  # (B, C)
        mx = jnp.max(x_f32, axis=(2, 3))                    # (B, C)
        mlp = lambda v: jnp.maximum(v @ w1.T, 0.0) @ w2.T
        out = jax.nn.sigmoid(mlp(avg) + mlp(mx))
        return out.reshape(x_f32.shape[0], x_f32.shape[1], 1, 1)

    # 1) f32 activation path (lane-aligned HW)
    y = channel_attention(x, w1, w2)
    jax.block_until_ready(y)
    assert jnp.allclose(y, reference(x), atol=1e-5, rtol=1e-5), "f32 mismatch"

    # 2) bf16 activation path (native-dtype stream + bf16 max accumulator)
    x_bf16 = x.astype(jnp.bfloat16)
    y_bf = channel_attention(x_bf16, w1, w2)
    jax.block_until_ready(y_bf)
    ref_bf = reference(x_bf16.astype(jnp.float32))
    assert jnp.allclose(y_bf.astype(jnp.float32), ref_bf,
                        atol=1e-2, rtol=1e-2), "bf16 mismatch"

    # 3) non-lane-aligned spatial extent (HW % 128 != 0 -> padded + tail mask)
    Hn = Wn = 15
    x_odd = jax.random.normal(jax.random.PRNGKey(3), (B, C, Hn, Wn),
                              dtype=jnp.float32)
    y_odd = channel_attention(x_odd, w1, w2)
    jax.block_until_ready(y_odd)
    assert jnp.allclose(y_odd, reference(x_odd),
                        atol=1e-5, rtol=1e-5), "padded-HW mismatch"

    print("KERNEL_OK")
</pallas_src>

<mosaic_0001>
module attributes {stable_mosaic.version = 11 : i64} {
  func.func @_pool_kernel(%arg0: i32, %arg1: i32, %arg2: i32, %arg3: memref<2x64x128xf32, #tpu.memory_space<vmem>>, %arg4: memref<1x2x64xf32, #tpu.memory_space<vmem>>, %arg5: memref<1x2x64xf32, #tpu.memory_space<vmem>>, %arg6: memref<2x64xf32, #tpu.memory_space<vmem>>, %arg7: memref<2x64xf32, #tpu.memory_space<vmem>>) attributes {dimension_semantics = [#tpu.dimension_semantics<parallel>, #tpu.dimension_semantics<parallel>, #tpu.dimension_semantics<arbitrary>], iteration_bounds = array<i64: 1, 2, 1>, scalar_prefetch = 0 : i64, scratch_operands = 2 : i64, tpu.core_type = #tpu.core_type<tc>, window_params = [{transform_indices = @transform_0, window_bounds = array<i64: 2, 64, 128>}, {transform_indices = @transform_1, window_bounds = array<i64: 1, 2, 64>}, {transform_indices = @transform_2, window_bounds = array<i64: 1, 2, 64>}]} {
    %c0_i32 = arith.constant 0 : i32
    %0 = arith.cmpi eq, %arg2, %c0_i32 : i32
    %1 = arith.extui %0 : i1 to i32
    %c0_i32_0 = arith.constant 0 : i32
    %2 = arith.cmpi ne, %1, %c0_i32_0 : i32
    scf.if %2 {
      %cst_14 = arith.constant 0.000000e+00 : f32
      %15 = vector.broadcast %cst_14 : f32 to vector<2x64xf32>
      %c0_15 = arith.constant 0 : index
      %c0_16 = arith.constant 0 : index
      %16 = vector.load %arg6[%c0_15, %c0_16] : memref<2x64xf32, #tpu.memory_space<vmem>>, vector<2x64xf32>
      tpu.vector_store %arg6[%c0_15, %c0_16], %15 {strides = array<i32>} : memref<2x64xf32, #tpu.memory_space<vmem>>, vector<2x64xf32>,
      %cst_17 = arith.constant 0xFF800000 : f32
      %17 = vector.broadcast %cst_17 : f32 to vector<2x64xf32>
      %c0_18 = arith.constant 0 : index
      %c0_19 = arith.constant 0 : index
      %18 = vector.load %arg7[%c0_18, %c0_19] : memref<2x64xf32, #tpu.memory_space<vmem>>, vector<2x64xf32>
      tpu.vector_store %arg7[%c0_18, %c0_19], %17 {strides = array<i32>} : memref<2x64xf32, #tpu.memory_space<vmem>>, vector<2x64xf32>,
    } else {
    }
    %c0 = arith.constant 0 : index
    %c0_1 = arith.constant 0 : index
    %c0_2 = arith.constant 0 : index
    %3 = vector.load %arg3[%c0, %c0_1, %c0_2] : memref<2x64x128xf32, #tpu.memory_space<vmem>>, vector<2x64x128xf32>
    %c0_3 = arith.constant 0 : index
    %c0_4 = arith.constant 0 : index
    %4 = vector.load %arg6[%c0_3, %c0_4] : memref<2x64xf32, #tpu.memory_space<vmem>>, vector<2x64xf32>
    %cst = arith.constant dense<0.000000e+00> : vector<2x64xf32>
    %5 = vector.multi_reduction <add>, %3, %cst [2] : vector<2x64x128xf32> to vector<2x64xf32>
    %6 = arith.addf %4, %5 : vector<2x64xf32>
    %c0_5 = arith.constant 0 : index
    %c0_6 = arith.constant 0 : index
    %7 = vector.load %arg6[%c0_5, %c0_6] : memref<2x64xf32, #tpu.memory_space<vmem>>, vector<2x64xf32>
    tpu.vector_store %arg6[%c0_5, %c0_6], %6 {strides = array<i32>} : memref<2x64xf32, #tpu.memory_space<vmem>>, vector<2x64xf32>,
    %c0_7 = arith.constant 0 : index
    %c0_8 = arith.constant 0 : index
    %8 = vector.load %arg7[%c0_7, %c0_8] : memref<2x64xf32, #tpu.memory_space<vmem>>, vector<2x64xf32>
    %cst_9 = arith.constant dense<0xFF800000> : vector<2x64xf32>
    %9 = vector.multi_reduction <maximumf>, %3, %cst_9 [2] : vector<2x64x128xf32> to vector<2x64xf32>
    %10 = arith.maximumf %8, %9 : vector<2x64xf32>
    %c0_10 = arith.constant 0 : index
    %c0_11 = arith.constant 0 : index
    %11 = vector.load %arg7[%c0_10, %c0_11] : memref<2x64xf32, #tpu.memory_space<vmem>>, vector<2x64xf32>
    tpu.vector_store %arg7[%c0_10, %c0_11], %10 {strides = array<i32>} : memref<2x64xf32, #tpu.memory_space<vmem>>, vector<2x64xf32>,
    %c0_i32_12 = arith.constant 0 : i32
    %12 = arith.cmpi eq, %arg2, %c0_i32_12 : i32
    %13 = arith.extui %12 : i1 to i32
    %c0_i32_13 = arith.constant 0 : i32
    %14 = arith.cmpi ne, %13, %c0_i32_13 : i32
    scf.if %14 {
      %c0_14 = arith.constant 0 : index
      %c0_15 = arith.constant 0 : index
      %15 = vector.load %arg6[%c0_14, %c0_15] : memref<2x64xf32, #tpu.memory_space<vmem>>, vector<2x64xf32>
      %c0_16 = arith.constant 0 : index
      %c0_17 = arith.constant 0 : index
      %c0_18 = arith.constant 0 : index
      %16 = vector.load %arg4[%c0_16, %c0_17, %c0_18] : memref<1x2x64xf32, #tpu.memory_space<vmem>>, vector<1x2x64xf32>
      %17 = vector.shape_cast %16 : vector<1x2x64xf32> to vector<2x64xf32>
      %18 = vector.shape_cast %15 : vector<2x64xf32> to vector<1x2x64xf32>
      tpu.vector_store %arg4[%c0_16, %c0_17, %c0_18], %18 {strides = array<i32>} : memref<1x2x64xf32, #tpu.memory_space<vmem>>, vector<1x2x64xf32>,
      %c0_19 = arith.constant 0 : index
      %c0_20 = arith.constant 0 : index
      %19 = vector.load %arg7[%c0_19, %c0_20] : memref<2x64xf32, #tpu.memory_space<vmem>>, vector<2x64xf32>
      %c0_21 = arith.constant 0 : index
      %c0_22 = arith.constant 0 : index
      %c0_23 = arith.constant 0 : index
      %20 = vector.load %arg5[%c0_21, %c0_22, %c0_23] : memref<1x2x64xf32, #tpu.memory_space<vmem>>, vector<1x2x64xf32>
      %21 = vector.shape_cast %20 : vector<1x2x64xf32> to vector<2x64xf32>
      %22 = vector.shape_cast %19 : vector<2x64xf32> to vector<1x2x64xf32>
      tpu.vector_store %arg5[%c0_21, %c0_22, %c0_23], %22 {strides = array<i32>} : memref<1x2x64xf32, #tpu.memory_space<vmem>>, vector<1x2x64xf32>,
    } else {
    }
    return
  }
  func.func @transform_0(%arg0: i32, %arg1: i32, %arg2: i32) -> (i32, i32, i32) {
    %c1_i32 = arith.constant 1 : i32
    %0 = arith.muli %arg1, %c1_i32 : i32
    %1 = arith.addi %0, %arg2 : i32
    %c0_i32 = arith.constant 0 : i32
    %c0_i32_0 = arith.constant 0 : i32
    return %arg0, %c0_i32, %1 : i32, i32, i32
  }
  func.func @transform_1(%arg0: i32, %arg1: i32, %arg2: i32) -> (i32, i32, i32) {
    %c0_i32 = arith.constant 0 : i32
    %c0_i32_0 = arith.constant 0 : i32
    return %arg1, %arg0, %c0_i32 : i32, i32, i32
  }
  func.func @transform_2(%arg0: i32, %arg1: i32, %arg2: i32) -> (i32, i32, i32) {
    %c0_i32 = arith.constant 0 : i32
    %c0_i32_0 = arith.constant 0 : i32
    return %arg1, %arg0, %c0_i32 : i32, i32, i32
  }
}

</mosaic_0001>

<bundles_post_ra>
// kernel: tpu_custom_call.1
= control target key start
LH: loop header
LB: loop body
LE: loop exit
PB: predicated region body
PF: predicated region fallthrough
CT: control target
= control target key end

     0   :  { %8 = vsyncpa [#allocation5], 0  ;;  %s1291_s0 = inlined_call_operand.hbm [shape: f32[2,64,256], index: 0, kind: input, shape index: {}]   ;;  %s1292_s1 = inlined_call_operand.hbm [shape: f32[2,2,64], index: 1, kind: output, shape index: {0}]   ;;  %s1293_s2 = inlined_call_operand.hbm [shape: f32[2,2,64], index: 2, kind: output, shape index: {1}]  }
   0x1   :  { %10 = vsyncpa [#allocation5 + $0x1], 0 }
   0x2   :  { %11 = vsyncpa [#allocation6], 0 }
   0x3   :  { %13 = vsyncpa [#allocation6 + $0x1], 0 }
   0x4   :  { %14 = vsyncpa [#allocation9], 0 }
   0x5   :  { %16 = vsyncpa [#allocation9 + $0x1], 0  ;;  %s924_s9 = smov 0   ;;  %s926_s10 = smov 0  }
   0x6   :  { %s928_s11 = smov 0   ;;  %s930_s12 = smov 0  }
   0x7   :  { %s932_s13 = smov 0   ;;  %s934_s14 = smov 0  }
   0x8 LB: > { %s667_s15 = sadd.s32 4294967295, %s899_s14   ;;  %s668_s16 = sadd.s32 4294967294, %s899_s14   ;;  %s899_s14 = sphi %s934_s14, %s22_s14   ;;  %s895_s13 = sphi %s932_s13, %s1307_s13   ;;  %s891_s12 = sphi %s930_s12, %s1306_s12   ;;  %s887_s11 = sphi %s928_s11, %s1305_s11   ;;  %s883_s10 = sphi %s926_s10, %s1304_s10   ;;  %s879_s9 = sphi %s924_s9, %s1303_s9  }
   0x9   : > { %s37_s17 = sadd.s32 1, %s895_s13  ;;  %s52_s18 = sadd.s32 1, %s887_s11 }
   0xa   : > { %p39_p0 = scmp.ge.s32.totalorder %s37_s17, 2  ;;  %p59_p1 = scmp.ne.s32.totalorder %s887_s11, %s883_s10 }
   0xb   : > { %p60_p2 = scmp.eq.s32.totalorder %s899_s14, 0  ;;  %p65_p3 = scmp.ne.s32.totalorder %s883_s10, %s879_s9 }
   0xc   : > { %s1309_s17 = smov (%p39_p0, %s37_s17), 0  ;;  %p66_p5 = scmp.eq.s32.totalorder %s667_s15, 0 }
   0xd   : > { %p965_p4 = por %p60_p2, %p59_p1  ;;  %s48_s20 = ssub.s32 %s895_s13, %s1309_s17 }
   0xe   : > { %p91_p6 = scmp.eq.s32.totalorder %s667_s15, 1  ;;  %p50_p7 = scmp.eq.s32.totalorder %s48_s20, 0 }
   0xf   : > { %p971_p8 = por %p66_p5, %p65_p3  ;;  %p97_p10 = scmp.eq.s32.totalorder %s668_s16, 1 }
  0x10   : > { %p975_p9 = por %p91_p6, %p59_p1  ;;  %p700_p13 = scmp.lt.s32.totalorder %s899_s14, 2 }
  0x11   : > { %s980_s23 = scalar_select %p50_p7, %s887_s11, %s52_s18  }
  0x12   : > { %s1297_s22 = scalar_select %p975_p9, 1, 0 }
  0x13   : > { %p982_p11 = por %p97_p10, %p65_p3  ;;  %s145_s25 = sand.u32 1, %s887_s11  }
  0x14   : > { %s671_s26 = sshll.u32 %s145_s25, 7  ;;  %s672_s27 = sshll.u32 %s895_s13, 7 }
  0x15   : > { %s1298_s24 = scalar_select %p982_p11, 1, 0 }
  0x16   : > { %s993_s30 = scalar_lea.hbm %s1291_s0, %s672_s27  ;;  %s149_s3 = scalar_lea.vmem [#allocation4], %s671_s26 }
  0x17   : > { %s159_s4 = sshll.u32 %s149_s3, 4  ;;  %p999_p0 = pnand %p700_p13, %p965_p4  ;;  %s995_s4 = int_to_ptr.vmem [resolvable:$true] %s159_s4 }
  0x18   : > { %s1003_s6 = scalar_lea.sflag [#allocation5], %s145_s25  ;;  %s755_s7 = scalar_lea.hbm %s993_s30, 2048 }
  0x19   : > { %p756_p1 = scmp.ne.s32.totalorder %s993_s30, %s755_s7  ;;  %p757_p2 = pneg %p999_p0 }
  0x1a   : > { %s760_s16 = scalar_lea.hbm %s1291_s0, 4096  ;;  %p761_p4 = scmp.lt.u32.totalorder %s993_s30, %s1291_s0 }
  0x1b   : > { %p758_p3 = pnand %p757_p2, %p756_p1  ;;  %p762_p6 = scmp.lt.u32.totalorder %s760_s16, %s755_s7 }
  0x1c   : > { %p764_p10 = scmp.lt.u32.totalorder %s755_s7, %s993_s30 }
  0x1d   : > { %p759_p5 = pneg %p758_p3  ;;  %p763_p7 = por %p762_p6, %p761_p4 }
  0x1f   : > { %p765_p13 = por %p764_p10, %p763_p7 }
  0x21   : > { %p766_p12 = pnand %p765_p13, %p759_p5 }
  0x23   : > { %769 = shalt.err (!%p766_p12)
}
  0x24   : > { %s770_s20 = scalar_lea.vmem %s995_s4, 2048  ;;  %s901_s25 = smov [#allocation4]  }
  0x25   : > { %p771_p1 = scmp.ne.s32.totalorder %s995_s4, %s770_s20  ;;  %s775_s26 = sshll.u32 %s901_s25, 4  ;;  %s776_s26 = int_to_ptr.vmem [resolvable:$false] %s775_s26 }
  0x26   : > { %s777_s27 = scalar_lea.vmem %s776_s26, 4096  ;;  %p778_p9 = scmp.lt.s32.totalorder %s995_s4, %s776_s26 }
  0x27   : > { %p773_p3 = pnand %p771_p1, %p757_p2  ;;  %p779_p4 = scmp.lt.s32.totalorder %s777_s27, %s770_s20 }
  0x29   : > { %p774_p11 = pneg %p773_p3  ;;  %p780_p6 = por %p779_p4, %p778_p9 }
  0x2b   : > { %p781_p7 = pnand %p780_p6, %p774_p11 }
  0x2d   : > { %784 = shalt.err (!%p781_p7)
}
  0x2e   : > { %s902_s28 = smov 256   ;;  %s903_s29 = smov 128  }
  0x2f   : > { %s904_s3 = smov 8   ;;  %p673_p12 = scmp.ge.s32.totalorder %s899_s14, 1 }
  0x30   : > { %692 = dma.hbm_to_vmem [thread:$0]  (!%p999_p0), %s993_s30, 2048, %s995_s4, %s1003_s6, %s902_s28, %s903_s29, %s904_s3  }
  0x31   : > { %p167_p2 = scmp.lt.s32.totalorder %s899_s14, 3 }
  0x33   : > { %p168_p5 = pnand %p673_p12, %p167_p2 }
  0x34   : > { %s1034_s7 = sand.u32 (!%p168_p5), 1, %s883_s10  }
  0x35   : > { %171 = sbr.rel (%p168_p5) target bundleno = 312 (0x138), region = 24  ;;  %s674_s8 = sshll.u32 (!%p168_p5), %s1034_s7, 7 }
  0x36   : > { %s174_s15 = scalar_lea.sflag (!%p168_p5), [#allocation5], %s1034_s7  ;;  %s1038_s16 = scalar_lea.vmem (!%p168_p5), [#allocation4], %s674_s8 }
  0x3c   : > { %866 = dma.done.wait (%p971_p8), %s174_s15, 2048  }
  0x3d   : > { %868 = vsyncadd (%p971_p8), %s174_s15, 4294965248  ;;  %v220_v0 = vld [vmem:[%s1038_s16 + $0x40] sm:$0xff]  ;;  %v221_v2 = vld [vmem:[%s1038_s16 + $0x48] sm:$0xff]  ;;  %vm209_vm0 = vcmask 517120   ;;  %v905_v16 = vmov 0.0   ;;  %v906_v17 = vmov -inf   ;;  %v277_v34 = vlaneseq }
  0x3e   : > { %v212_v1 = vld [vmem:[%s1038_s16] sm:$0xff]  ;;  %245 = vadd.xlane.f32.xlu1 %v220_v0  ;;  %v213_v3 = vld [vmem:[%s1038_s16 + $0x8] sm:$0xff]  ;;  %v222_v4 = vld [vmem:[%s1038_s16 + $0x50] sm:$0xff]  ;;  %210 = vst.msk [vmem:[#allocation2] sm:$0x3] %vm209_vm0, %v905_v16  ;;  %vm288_vm1 = vcmask 130112  }
  0x3f   : > { %229 = vadd.xlane.f32.xlu0 %v212_v1  ;;  %v214_v5 = vld [vmem:[%s1038_s16 + $0x10] sm:$0xff]  ;;  %v223_v6 = vld [vmem:[%s1038_s16 + $0x58] sm:$0xff]  ;;  %v224_v8 = vld [vmem:[%s1038_s16 + $0x60] sm:$0xff]  ;;  %211 = vst.msk [vmem:[#allocation3] sm:$0x3] %vm209_vm0, %v906_v17  ;;  %v278_v37 = vand.u32 127, %v277_v34 }
  0x40   : > { %v215_v7 = vld [vmem:[%s1038_s16 + $0x18] sm:$0xff]  ;;  %v216_v9 = vld [vmem:[%s1038_s16 + $0x20] sm:$0xff]  ;;  %v225_v10 = vld [vmem:[%s1038_s16 + $0x68] sm:$0xff]  ;;  %v280_v41 = vshrl.u32 %v277_v34, 7  ;;  %vm295_vm2 = vcmask 195712   ;;  %vm302_vm3 = vcmask 261312  }
  0x41   : > { %v217_v11 = vld [vmem:[%s1038_s16 + $0x28] sm:$0xff]  ;;  %v226_v12 = vld [vmem:[%s1038_s16 + $0x70] sm:$0xff]  ;;  %v227_v14 = vld [vmem:[%s1038_s16 + $0x78] sm:$0xff]  ;;  %v283_v40 = vadd.s32 4294967288, %v278_v37  ;;  %v290_v42 = vadd.s32 4294967280, %v278_v37  ;;  %v297_v45 = vadd.s32 4294967272, %v278_v37 }
  0x42   : > { %247 = vadd.xlane.f32.xlu1 %v221_v2  ;;  %v218_v13 = vld [vmem:[%s1038_s16 + $0x30] sm:$0xff]  ;;  %v219_v15 = vld [vmem:[%s1038_s16 + $0x38] sm:$0xff]  ;;  %v304_v46 = vadd.s32 4294967264, %v278_v37  ;;  %v311_v48 = vadd.s32 4294967256, %v278_v37  ;;  %v318_v49 = vadd.s32 4294967248, %v278_v37  ;;  %v325_v50 = vadd.s32 4294967240, %v278_v37 }
  0x43   : > { %231 = vadd.xlane.f32.xlu0 %v213_v3  ;;  %v286_v47 = vsub.s32 %v283_v40, %v280_v41  ;;  %v281_v51 = vsub.s32 %v278_v37, %v280_v41  ;;  %v293_v52 = vsub.s32 %v290_v42, %v280_v41  ;;  %v1110_v55 = vsub.s32 %v297_v45, %v280_v41  ;;  %s675_s21 = sshll.u32 %s1034_s7, 1  ;;  %s679_s30 = sshll.u32 %s891_s12, 5 }
  0x44   : > { %v1112_v56 = vsub.s32 %v304_v46, %v280_v41  ;;  %vm309_vm4 = vcmask 326912   ;;  %v1115_v58 = vsub.s32 %v311_v48, %v280_v41  ;;  %vm316_vm5 = vcmask 392512   ;;  %s195_s4 = scalar_lea.vmem [#allocation7], %s675_s21  ;;  %s1203_s19 = scalar_lea.hbm %s1292_s1, %s679_s30 }
  0x45   : > { %v1117_v59 = vsub.s32 %v318_v49, %v280_v41  ;;  %vm323_vm6 = vcmask 458112   ;;  %v1122_v63 = vsub.s32 %v325_v50, %v280_v41  ;;  %vm330_vm7 = vcmask 523712   ;;  %v228_v49 = vld [vmem:[#allocation2] sm:$0x3]  ;;  %s535_s5 = sshll.u32 %s195_s4, 4  ;;  %s1207_s20 = scalar_lea.vmem [#allocation8], %s675_s21  ;;  %s1205_s5 = int_to_ptr.vmem [resolvable:$true] %s535_s5 }
  0x46   : > { %380 = vmax.xlane.f32.xlu1 %v213_v3  ;;  %vm371_vm8 = vcmask 1041409   ;;  %s549_s25 = sshll.u32 %s1207_s20, 4  ;;  %s516_s26 = scalar_lea.sflag [#allocation6], %s1034_s7  ;;  %s1242_s25 = int_to_ptr.vmem [resolvable:$true] %s549_s25 }
  0x47   : > { %378 = vmax.xlane.f32.xlu0 %v212_v1  ;;  %s785_s27 = scalar_lea.vmem %s1205_s5, 32  ;;  %p1300_p9 = scmp.ne.s32.totalorder %s1297_s22, 0 }
  0x48   : > { %p786_p8 = scmp.ne.s32.totalorder %s1205_s5, %s785_s27  ;;  %s907_s28 = smov [#allocation7]  }
  0x49   : > { %s789_s29 = sshll.u32 %s907_s28, 4  ;;  %s790_s29 = int_to_ptr.vmem [resolvable:$false] %s789_s29 }
  0x4a   : > { %396 = vmax.xlane.f32.xlu1 %v221_v2  ;;  %p787_p11 = pnand %p786_p8, %p1300_p9  ;;  %s791_s3 = scalar_lea.vmem %s790_s29, 64 }
  0x4b   : > { %394 = vmax.xlane.f32.xlu0 %v220_v0  ;;  %p792_p10 = scmp.lt.s32.totalorder %s1205_s5, %s790_s29  ;;  %p793_p13 = scmp.lt.s32.totalorder %s791_s3, %s785_s27 }
  0x4c   : > { %p788_p0 = pneg %p787_p11 }
  0x4d   : > { %p794_p1 = por %p793_p13, %p792_p10 }
  0x4e   : > { %249 = vadd.xlane.f32.xlu1 %v222_v4 }
  0x4f   : > { %233 = vadd.xlane.f32.xlu0 %v214_v5  ;;  %p795_p3 = pnand %p794_p1, %p788_p0 }
  0x52   : > { %398 = vmax.xlane.f32.xlu1 %v222_v4 }
  0x53   : > { %382 = vmax.xlane.f32.xlu0 %v214_v5 }
  0x56   : > { %251 = vadd.xlane.f32.xlu1 %v223_v6 }
  0x57   : > { %235 = vadd.xlane.f32.xlu0 %v215_v7 }
  0x5a   : > { %400 = vmax.xlane.f32.xlu1 %v223_v6 }
  0x5b   : > { %384 = vmax.xlane.f32.xlu0 %v215_v7 }
  0x5e   : > { %253 = vadd.xlane.f32.xlu1 %v224_v8 }
  0x5f   : > { %237 = vadd.xlane.f32.xlu0 %v216_v9 }
  0x62   : > { %402 = vmax.xlane.f32.xlu1 %v224_v8 }
  0x63   : > { %386 = vmax.xlane.f32.xlu0 %v216_v9 }
  0x66   : > { %255 = vadd.xlane.f32.xlu1 %v225_v10 }
  0x67   : > { %239 = vadd.xlane.f32.xlu0 %v217_v11 }
  0x6a   : > { %404 = vmax.xlane.f32.xlu1 %v225_v10 }
  0x6b   : > { %388 = vmax.xlane.f32.xlu0 %v217_v11 }
  0x6e   : > { %257 = vadd.xlane.f32.xlu1 %v226_v12 }
  0x6f   : > { %241 = vadd.xlane.f32.xlu0 %v218_v13 }
  0x72   : > { %406 = vmax.xlane.f32.xlu1 %v226_v12 }
  0x73   : > { %390 = vmax.xlane.f32.xlu0 %v218_v13 }
  0x76   : > { %259 = vadd.xlane.f32.xlu1 %v227_v14 }
  0x77   : > { %243 = vadd.xlane.f32.xlu0 %v219_v15 }
  0x7a   : > { %408 = vmax.xlane.f32.xlu1 %v227_v14 }
  0x7b   : > { %392 = vmax.xlane.f32.xlu0 %v219_v15 }
  0xcb   : > { %v1062_v18 = vpop.xlane.xlu1 %245 }
  0xcc   : > { %v1064_v19 = vpop.xlane.xlu0 %229  ;;  %v335_v0 = vrot.slane %v1062_v18, %v281_v51 }
  0xcd   : > { %v282_v6 = vrot.slane %v1064_v19, %v281_v51 }
  0xcf   : > { %v1066_v20 = vpop.xlane.xlu1 %247 }
  0xd0   : > { %v1068_v21 = vpop.xlane.xlu0 %231  ;;  %v339_v57 = vrot.slane %v1066_v20, %v286_v47 }
  0xd1   : > { %v287_v60 = vrot.slane %v1068_v21, %v286_v47 }
  0xd2   : > { %v340_v10 = vsel %vm288_vm1, %v339_v57, %v335_v0 }
  0xd3   : > { %v1070_v22 = vpop.xlane.xlu1 %380  ;;  %v289_v13 = vsel %vm288_vm1, %v287_v60, %v282_v6 }
  0xd4   : > { %v1072_v23 = vpop.xlane.xlu0 %378  ;;  %v433_v61 = vrot.slane %v1070_v22, %v286_v47 }
  0xd5   : > { %v429_v62 = vrot.slane %v1072_v23, %v281_v51 }
  0xd7   : > { %v1074_v24 = vpop.xlane.xlu1 %396  ;;  %v434_v14 = vsel %vm288_vm1, %v433_v61, %v429_v62 }
  0xd8   : > { %v1076_v25 = vpop.xlane.xlu0 %394  ;;  %v472_v1 = vrot.slane %v1074_v24, %v286_v47 }
  0xd9   : > { %v468_v2 = vrot.slane %v1076_v25, %v281_v51 }
  0xdb   : > { %v1078_v26 = vpop.xlane.xlu1 %249  ;;  %v473_v17 = vsel %vm288_vm1, %v472_v1, %v468_v2  ;;  %v377_v2 = vld [vmem:[#allocation3] sm:$0x3] }
  0xdc   : > { %v1080_v27 = vpop.xlane.xlu0 %233  ;;  %v344_v3 = vrot.slane %v1078_v26, %v293_v52 }
  0xdd   : > { %v294_v7 = vrot.slane %v1080_v27, %v293_v52 }
  0xde   : > { %v345_v18 = vsel %vm295_vm2, %v344_v3, %v340_v10 }
  0xdf   : > { %v1082_v28 = vpop.xlane.xlu1 %398  ;;  %v296_v23 = vsel %vm295_vm2, %v294_v7, %v289_v13 }
  0xe0   : > { %v1084_v29 = vpop.xlane.xlu0 %382  ;;  %v477_v8 = vrot.slane %v1082_v28, %v293_v52 }
  0xe1   : > { %v438_v9 = vrot.slane %v1084_v29, %v293_v52 }
  0xe2   : > { %v478_v24 = vsel %vm295_vm2, %v477_v8, %v473_v17 }
  0xe3   : > { %v1086_v30 = vpop.xlane.xlu1 %251  ;;  %v439_v25 = vsel %vm295_vm2, %v438_v9, %v434_v14 }
  0xe4   : > { %v1088_v31 = vpop.xlane.xlu0 %235  ;;  %v349_v11 = vrot.slane %v1086_v30, %v1110_v55 }
  0xe5   : > { %v301_v12 = vrot.slane %v1088_v31, %v1110_v55 }
  0xe6   : > { %v350_v27 = vsel %vm302_vm3, %v349_v11, %v345_v18 }
  0xe7   : > { %v1090_v32 = vpop.xlane.xlu1 %400  ;;  %v303_v28 = vsel %vm302_vm3, %v301_v12, %v296_v23 }
  0xe8   : > { %v1092_v33 = vpop.xlane.xlu0 %384  ;;  %v482_v15 = vrot.slane %v1090_v32, %v1110_v55 }
  0xe9   : > { %v443_v32 = vrot.slane %v1092_v33, %v1110_v55 }
  0xea   : > { %v483_v31 = vsel %vm302_vm3, %v482_v15, %v478_v24 }
  0xeb   : > { %v1094_v35 = vpop.xlane.xlu1 %253  ;;  %v444_v50 = vsel %vm302_vm3, %v443_v32, %v439_v25 }
  0xec   : > { %v1096_v36 = vpop.xlane.xlu0 %237  ;;  %v354_v16 = vrot.slane %v1094_v35, %v1112_v56 }
  0xed   : > { %v308_v19 = vrot.slane %v1096_v36, %v1112_v56 }
  0xee   : > { %v355_v34 = vsel %vm309_vm4, %v354_v16, %v350_v27 }
  0xef   : > { %v1098_v38 = vpop.xlane.xlu1 %402  ;;  %v310_v36 = vsel %vm309_vm4, %v308_v19, %v303_v28 }
  0xf0   : > { %v1100_v39 = vpop.xlane.xlu0 %386  ;;  %v487_v35 = vrot.slane %v1098_v38, %v1112_v56 }
  0xf1   : > { %v448_v37 = vrot.slane %v1100_v39, %v1112_v56 }
  0xf2   : > { %v488_v51 = vsel %vm309_vm4, %v487_v35, %v483_v31 }
  0xf3   : > { %v1102_v43 = vpop.xlane.xlu1 %255 }
  0xf4   : > { %v1104_v44 = vpop.xlane.xlu0 %239  ;;  %v359_v20 = vrot.slane %v1102_v43, %v1115_v58 }
  0xf5   : > { %v315_v26 = vrot.slane %v1104_v44, %v1115_v58 }
  0xf6   : > { %v360_v40 = vsel %vm316_vm5, %v359_v20, %v355_v34 }
  0xf7   : > { %v1106_v53 = vpop.xlane.xlu1 %404  ;;  %v317_v44 = vsel %vm316_vm5, %v315_v26, %v310_v36 }
  0xf8   : > { %v1108_v54 = vpop.xlane.xlu0 %388  ;;  %v492_v41 = vrot.slane %v1106_v53, %v1115_v58 }
  0xf9   : > { %v453_v33 = vrot.slane %v1108_v54, %v1115_v58  ;;  %v449_v54 = vsel %vm309_vm4, %v448_v37, %v444_v50 }
  0xfa   : > { %v493_v55 = vsel %vm316_vm5, %v492_v41, %v488_v51 }
  0xfb   : > { %v258_v4 = vpop.xlane.xlu1 %257 }
  0xfc   : > { %v242_v5 = vpop.xlane.xlu0 %241  ;;  %v364_v29 = vrot.slane %v258_v4, %v1117_v59 }
  0xfd   : > { %v322_v30 = vrot.slane %v242_v5, %v1117_v59 }
  0xfe   : > { %v365_v46 = vsel %vm323_vm6, %v364_v29, %v360_v40 }
  0xff   : > { %v407_v21 = vpop.xlane.xlu1 %406  ;;  %v324_v39 = vsel %vm323_vm6, %v322_v30, %v317_v44 }
 0x100   : > { %v391_v22 = vpop.xlane.xlu0 %390  ;;  %v497_v47 = vrot.slane %v407_v21, %v1117_v59 }
 0x101   : > { %v458_v48 = vrot.slane %v391_v22, %v1117_v59  ;;  %v454_v59 = vsel %vm316_vm5, %v453_v33, %v449_v54 }
 0x102   : > { %v498_v0 = vsel %vm323_vm6, %v497_v47, %v493_v55 }
 0x103   : > { %v260_v42 = vpop.xlane.xlu1 %259  ;;  %v459_v1 = vsel %vm323_vm6, %v458_v48, %v454_v59 }
 0x104   : > { %v244_v43 = vpop.xlane.xlu0 %243  ;;  %v369_v45 = vrot.slane %v260_v42, %v1122_v63 }
 0x105   : > { %v329_v38 = vrot.slane %v244_v43, %v1122_v63 }
 0x106   : > { %v370_v52 = vsel %vm330_vm7, %v369_v45, %v365_v46 }
 0x107   : > { %v331_v53 = vsel %vm330_vm7, %v329_v38, %v324_v39  ;;  %v409_v57 = vpop.xlane.xlu1 %408 }
 0x108   : > { %v372_v56 = vsel %vm371_vm8, %v370_v52, %v331_v53  ;;  %v393_v58 = vpop.xlane.xlu0 %392  ;;  %v502_v61 = vrot.slane %v409_v57, %v1122_v63 }
 0x109   : > { %v374_v60 = vadd.f32 %v372_v56, %v228_v49  ;;  %v463_v62 = vrot.slane %v393_v58, %v1122_v63 }
 0x10a   : > { %v503_v3 = vsel %vm330_vm7, %v502_v61, %v498_v0 }
 0x10b   : > { %376 = vst.msk [vmem:[#allocation2] sm:$0x3] %vm209_vm0, %v374_v60  ;;  %v464_v4 = vsel %vm330_vm7, %v463_v62, %v459_v1 }
 0x10c   : > { %v504_v5 = vsel %vm371_vm8, %v503_v3, %v464_v4 }
 0x10d   : > { %v506_v6 = vmax.f32 %v377_v2, %v504_v5 }
 0x10f   : > { %507 = vst.msk [vmem:[#allocation3] sm:$0x3] %vm209_vm0, %v506_v6 }
 0x112   : > { %v511_v63 = vld [vmem:[#allocation2] sm:$0x3] }
 0x113   : > { %512 = vst.msk [vmem:[%s195_s4] sm:$0x3] %vm209_vm0, %v511_v63 }
 0x114   : > { %798 = shalt.err (!%p795_p3)
}
 0x115   : > { %s799_s8 = scalar_lea.hbm %s1203_s19, 32  ;;  %s803_s21 = scalar_lea.hbm %s1292_s1, 64 }
 0x116   : > { %p800_p4 = scmp.ne.s32.totalorder %s1203_s19, %s799_s8  ;;  %p804_p12 = scmp.lt.u32.totalorder %s1203_s19, %s1292_s1 }
 0x117   : > { %p805_p2 = scmp.lt.u32.totalorder %s803_s21, %s799_s8  ;;  %p807_p8 = scmp.lt.u32.totalorder %s799_s8, %s1203_s19 }
 0x118   : > { %p801_p6 = pnand %p800_p4, %p1300_p9 }
 0x119   : > { %p806_p5 = por %p805_p2, %p804_p12 }
 0x11a   : > { %p802_p7 = pneg %p801_p6 }
 0x11b   : > { %p808_p11 = por %p807_p8, %p806_p5 }
 0x11d   : > { %p809_p0 = pnand %p808_p11, %p802_p7 }
 0x11f   : > { %812 = shalt.err (!%p809_p0)
}
 0x120   : > { %685 = dma.vmem_to_hbm [thread:$0]  (%p1300_p9), %s1205_s5, 32, %s1203_s19, %s516_s26   ;;  %v513_v7 = vld [vmem:[#allocation3] sm:$0x3] }
 0x121   : > { %s1238_s28 = scalar_lea.hbm %s1293_s2, %s679_s30  ;;  %514 = vst.msk [vmem:[%s1207_s20] sm:$0x3] %vm209_vm0, %v513_v7  ;;  %s521_s29 = scalar_lea.sflag [#allocation9], %s1034_s7 }
 0x122   : > { %s813_s3 = scalar_lea.vmem %s1242_s25, 32  ;;  %s908_s12 = smov [#allocation8]  }
 0x123   : > { %p814_p10 = scmp.ne.s32.totalorder %s1242_s25, %s813_s3  ;;  %s817_s5 = sshll.u32 %s908_s12, 4  ;;  %s818_s5 = int_to_ptr.vmem [resolvable:$false] %s817_s5 }
 0x124   : > { %s819_s30 = scalar_lea.vmem %s818_s5, 64  ;;  %p820_p3 = scmp.lt.s32.totalorder %s1242_s25, %s818_s5 }
 0x125   : > { %p815_p13 = pnand %p814_p10, %p1300_p9  ;;  %p821_p4 = scmp.lt.s32.totalorder %s819_s30, %s813_s3 }
 0x127   : > { %p816_p1 = pneg %p815_p13  ;;  %p822_p6 = por %p821_p4, %p820_p3 }
 0x129   : > { %p823_p7 = pnand %p822_p6, %p816_p1 }
 0x12b   : > { %826 = shalt.err (!%p823_p7)
}
 0x12c   : > { %s827_s7 = scalar_lea.hbm %s1238_s28, 32  ;;  %s831_s26 = scalar_lea.hbm %s1293_s2, 64 }
 0x12d   : > { %p828_p12 = scmp.ne.s32.totalorder %s1238_s28, %s827_s7  ;;  %p832_p8 = scmp.lt.u32.totalorder %s1238_s28, %s1293_s2 }
 0x12e   : > { %p833_p11 = scmp.lt.u32.totalorder %s831_s26, %s827_s7  ;;  %p835_p10 = scmp.lt.u32.totalorder %s827_s7, %s1238_s28 }
 0x12f   : > { %p829_p2 = pnand %p828_p12, %p1300_p9 }
 0x130   : > { %p834_p0 = por %p833_p11, %p832_p8 }
 0x131   : > { %p830_p5 = pneg %p829_p2 }
 0x132   : > { %p836_p13 = por %p835_p10, %p834_p0 }
 0x134   : > { %p837_p1 = pnand %p836_p13, %p830_p5 }
 0x136   : > { %840 = shalt.err (!%p837_p1)
}
 0x137   : > { %686 = dma.vmem_to_hbm [thread:$0]  (%p1300_p9), %s1242_s25, 32, %s1238_s28, %s521_s29  }
 0x138 PF: > { %s561_s16 = sand.u32 1, %s879_s9   ;;  %p1301_p3 = scmp.ne.s32.totalorder %s1298_s24, 0 }
 0x139   : > { %p1302_p4 = scmp.ge.s32.totalorder %s899_s14, 2  ;;  %s562_s21 = scalar_lea.sflag [#allocation6], %s561_s16 }
 0x13b   : > { %p694_p6 = pnand %p1302_p4, %p1301_p3 }
 0x13d   : > { %870 = dma.done.wait (!%p694_p6), %s562_s21, 32  }
 0x13e   : > { %872 = vsyncadd (!%p694_p6), %s562_s21, 4294967264  ;;  %s571_s4 = scalar_lea.sflag [#allocation9], %s561_s16 }
 0x13f   : > { %874 = dma.done.wait (!%p694_p6), %s571_s4, 32  }
 0x140   : > { %876 = vsyncadd (!%p694_p6), %s571_s4, 4294967264  ;;  %s22_s14 = sadd.s32 1, %s899_s14   ;;  %s1303_s9 = smov %s883_s10 }
 0x141   : > { %p19_p7 = scmp.ge.s32.totalorder %s22_s14, 4   ;;  %s1304_s10 = smov %s887_s11 }
 0x142   : > { %s1305_s11 = smov %s980_s23  ;;  %s1306_s12 = smov %s895_s13 }
 0x143   : > { %s1307_s13 = smov %s1309_s17  ;;  %21 = sbr.rel (!%p19_p7) target bundleno = 8 (0x8), region = 94 }
 0x14a   :  { %576 = vsyncpa [#allocation5], 1 }
 0x14b   :  { %578 = vsyncpa [#allocation5 + $0x1], 1 }
 0x14c   :  { %579 = vsyncpa [#allocation6], 1 }
 0x14d   :  { %581 = vsyncpa [#allocation6 + $0x1], 1 }
 0x14e   :  { %582 = vsyncpa [#allocation9], 1 }
 0x14f   :  { %584 = vsyncpa [#allocation9 + $0x1], 1 }

</bundles_post_ra>
